<compile_context>
chip_gen: v7x
topology: tpu7x:2x2x1
jax: 0.10.0
libtpu: 0.0.40
codegen_flags: <defaults>
</compile_context>

<pallas_src>
import functools

import jax
import jax.numpy as jnp
from jax.experimental import pallas as pl
from jax.experimental.pallas import tpu as pltpu


def _round_up(x: int, m: int) -> int:
    return ((x + m - 1) // m) * m


def _vmem_capacity_bytes() -> int:
    """Physical VMEM per TensorCore; conservative fallback = v7x (64 MiB)."""
    try:
        info = pltpu.get_tpu_info()
        cap = getattr(info, "vmem_capacity_bytes", None)
        if cap:
            return int(cap)
    except Exception:
        pass
    return 64 * 1024 * 1024


def _ffn_kernel(x_ref, w1_ref, b1_ref, w2_ref, b2_ref, o_ref):
    # x_ref:  (TN, H) row tile of flattened positions
    # w1_ref: (H, H)  conv1 weight stored as (in, out)  -> x @ w1
    # b1_ref: (1, H)  f32
    # w2_ref: (H, H)  conv2 weight stored as (in, out)
    # b2_ref: (1, H)  f32
    x = x_ref[...]
    h = jnp.dot(x.astype(w1_ref.dtype), w1_ref[...],
                preferred_element_type=jnp.float32) + b1_ref[...]
    h = jnp.maximum(h, 0.0)                      # ReLU
    # TODO(synk): dropout1/dropout2 are identity in eval mode; training-mode
    # stochastic dropout (pltpu.prng_*) is not implemented here.
    y = jnp.dot(h.astype(w2_ref.dtype), w2_ref[...],
                preferred_element_type=jnp.float32) + b2_ref[...]
    o_ref[...] = (y + x.astype(jnp.float32)).astype(o_ref.dtype)   # residual


@functools.partial(jax.jit, static_argnames=("row_tile", "use_bf16_matmul"))
def pointwise_feedforward(x, w1, b1, w2, b2, *, row_tile=None,
                          use_bf16_matmul=False):
    """x: (B, L, H). w1/w2: (H_out, H_in) torch Conv1d weights (kernel_size=1
    squeezed). b1/b2: (H,). Returns (B, L, H)."""
    B, L, H = x.shape
    N = B * L
    dtype = x.dtype
    x_isz = jnp.dtype(dtype).itemsize

    # MXU operand dtype. bf16 restores full MXU rate and halves resident-weight
    # bytes but rounds the matmul inputs (accumulation stays f32) -> no longer
    # bit-faithful to the f32 PyTorch module; gated behind an explicit flag.
    mx_dtype = jnp.bfloat16 if use_bf16_matmul else dtype
    w_isz = jnp.dtype(mx_dtype).itemsize

    # ---- VMEM budget (generation aware: ~128 MiB v5e/v6e, 64 MiB v7x). ----
    vmem_cap = _vmem_capacity_bytes()
    budget = (vmem_cap * 3) // 4

    # Resident constants: two (H, H) weights + two (1, H) f32 biases. Their
    # index_map is constant so they are never re-fetched; single-buffer them
    # when they are big enough for the extra copy to matter.
    const_bytes_1buf = 2 * H * H * w_isz + 2 * H * 4
    single_buffer_consts = const_bytes_1buf > (4 << 20)
    const_buf = 1 if single_buffer_consts else 2
    const_bytes = const_buf * const_bytes_1buf
    if const_bytes > budget:
        # TODO(synk): K-tile the hidden dim (stream w1 column tiles / w2 row
        # tiles over an 'arbitrary' reduction axis with an f32 accumulator)
        # for very large H instead of requiring fully resident weights.
        raise ValueError(
            f"Resident weights ({const_bytes / 2**20:.1f} MiB) exceed the VMEM "
            f"budget ({budget / 2**20:.1f} MiB); pass use_bf16_matmul=True or "
            "reduce hidden_units.")

    # ---- Row tile: amortize the ~0.35 us per-grid-step overhead, stay within
    # VMEM (2 in-bufs + 2 out-bufs of the activation tile + constants), and
    # keep >= 2 (target 4) row blocks so "parallel" uses both v7x TensorCores.
    if row_tile is None:
        row_tile = 4096 if H <= 512 else (2048 if H <= 1024 else 1024)
    per_row_bytes = 2 * H * x_isz + 2 * H * x_isz           # in + out, 2-deep
    tn_vmem = max(8, (budget - const_bytes) // per_row_bytes)
    tn_blocks = max(8, _round_up(-(-N // 4), 8))             # aim for >=4 blocks
    TN = max(8, min(row_tile, tn_vmem, tn_blocks, _round_up(N, 8)))
    TN = (TN // 8) * 8
    grid = (pl.cdiv(N, TN),)        # partial last block is masked by Pallas

    # Torch Conv1d: out[o] = sum_i W[o, i] * in[i] + b[o]  ->  X @ W.T + b
    w1_t = jnp.transpose(w1).astype(mx_dtype)
    w2_t = jnp.transpose(w2).astype(mx_dtype)
    b1_r = b1.reshape(1, H).astype(jnp.float32)
    b2_r = b2.reshape(1, H).astype(jnp.float32)
    x2d = x.reshape(N, H)           # free reshape; no padded copy, no slice

    def const_spec(shape):
        idx = lambda i: (0,) * len(shape)
        if single_buffer_consts:
            try:
                return pl.BlockSpec(shape, idx, pipeline_mode=pl.Buffered(1))
            except TypeError:       # older jax without pipeline_mode kwarg
                pass
        return pl.BlockSpec(shape, idx)

    cost = pl.CostEstimate(
        flops=4 * N * H * H + 3 * N * H,
        transcendentals=0,
        bytes_accessed=(2 * N * H * x_isz            # x read + out write
                        + 2 * H * H * w_isz          # both weights
                        + 2 * H * 4),                # both biases (f32)
    )

    vmem_needed = 4 * TN * H * x_isz + const_bytes
    vmem_limit = int(min(vmem_cap, max(vmem_needed * 5 // 4, 32 * 1024 * 1024)))

    out2d = pl.pallas_call(
        _ffn_kernel,
        out_shape=jax.ShapeDtypeStruct((N, H), dtype),
        grid_spec=pltpu.PrefetchScalarGridSpec(
            num_scalar_prefetch=0,
            grid=grid,
            in_specs=[
                pl.BlockSpec((TN, H), lambda i: (i, 0)),   # x: streamed rows
                const_spec((H, H)),                        # w1: resident
                const_spec((1, H)),                        # b1: resident
                const_spec((H, H)),                        # w2: resident
                const_spec((1, H)),                        # b2: resident
            ],
            out_specs=pl.BlockSpec((TN, H), lambda i: (i, 0)),
        ),
        compiler_params=pltpu.CompilerParams(
            dimension_semantics=("parallel",),
            vmem_limit_bytes=vmem_limit,
        ),
        cost_estimate=cost,
    )(x2d, w1_t, b1_r, w2_t, b2_r)

    return out2d.reshape(B, L, H)


def _reference(x, w1, b1, w2, b2):
    # Pure-JAX reference mirroring the PyTorch module (eval mode).
    h = jnp.einsum("blh,oh->blo", x, w1) + b1
    h = jnp.maximum(h, 0.0)
    y = jnp.einsum("blh,oh->blo", h, w2) + b2
    return y + x


if __name__ == "__main__":
    B, L, H = 2, 8, 32  # batch, seq_len, hidden_units
    key = jax.random.PRNGKey(0)
    kx, kw1, kb1, kw2, kb2 = jax.random.split(key, 5)

    x = jax.random.normal(kx, (B, L, H), dtype=jnp.float32)

    # Deterministic Conv1d-style parameter init: U(-1/sqrt(fan_in), 1/sqrt(fan_in))
    bound = 1.0 / (H ** 0.5)
    w1 = jax.random.uniform(kw1, (H, H), minval=-bound, maxval=bound, dtype=jnp.float32)
    b1 = jax.random.uniform(kb1, (H,), minval=-bound, maxval=bound, dtype=jnp.float32)
    w2 = jax.random.uniform(kw2, (H, H), minval=-bound, maxval=bound, dtype=jnp.float32)
    b2 = jax.random.uniform(kb2, (H,), minval=-bound, maxval=bound, dtype=jnp.float32)

    out = pointwise_feedforward(x, w1, b1, w2, b2)
    out = jax.block_until_ready(out)

    ref = _reference(x, w1, b1, w2, b2)
    assert out.shape == (B, L, H)
    assert jnp.allclose(out, ref, atol=1e-5, rtol=1e-5), "mismatch vs reference"

    print("KERNEL_OK")
</pallas_src>

<mosaic_0001>
module attributes {stable_mosaic.version = 11 : i64} {
  func.func @_ffn_kernel(%arg0: i32, %arg1: memref<8x32xf32, #tpu.memory_space<vmem>>, %arg2: memref<32x32xf32, #tpu.memory_space<vmem>>, %arg3: memref<1x32xf32, #tpu.memory_space<vmem>>, %arg4: memref<32x32xf32, #tpu.memory_space<vmem>>, %arg5: memref<1x32xf32, #tpu.memory_space<vmem>>, %arg6: memref<8x32xf32, #tpu.memory_space<vmem>>) attributes {dimension_semantics = [#tpu.dimension_semantics<parallel>], iteration_bounds = array<i64: 2>, scalar_prefetch = 0 : i64, scratch_operands = 0 : i64, tpu.core_type = #tpu.core_type<tc>, window_params = [{transform_indices = @transform_0, window_bounds = array<i64: 8, 32>}, {pipeline_mode = #tpu.pipeline_mode<synchronous>, transform_indices = @transform_1, window_bounds = array<i64: 32, 32>}, {pipeline_mode = #tpu.pipeline_mode<synchronous>, transform_indices = @transform_2, window_bounds = array<i64: 1, 32>}, {pipeline_mode = #tpu.pipeline_mode<synchronous>, transform_indices = @transform_3, window_bounds = array<i64: 32, 32>}, {pipeline_mode = #tpu.pipeline_mode<synchronous>, transform_indices = @transform_4, window_bounds = array<i64: 1, 32>}, {transform_indices = @transform_5, window_bounds = array<i64: 8, 32>}]} {
    %c0 = arith.constant 0 : index
    %c0_0 = arith.constant 0 : index
    %0 = vector.load %arg1[%c0, %c0_0] : memref<8x32xf32, #tpu.memory_space<vmem>>, vector<8x32xf32>
    %c0_1 = arith.constant 0 : index
    %c0_2 = arith.constant 0 : index
    %1 = vector.load %arg2[%c0_1, %c0_2] : memref<32x32xf32, #tpu.memory_space<vmem>>, vector<32x32xf32>
    %cst = arith.constant dense<0.000000e+00> : vector<8x32xf32>
    %2 = tpu.matmul %0, %1, %cst {dimension_numbers = #tpu.dot_dimension_numbers<[1], [0], [0], [1], [0, 0, 1, 1], [], []>} : vector<8x32xf32>, vector<32x32xf32>, vector<8x32xf32> -> vector<8x32xf32>
    %c0_3 = arith.constant 0 : index
    %c0_4 = arith.constant 0 : index
    %3 = vector.load %arg3[%c0_3, %c0_4] : memref<1x32xf32, #tpu.memory_space<vmem>>, vector<1x32xf32>
    %4 = vector.broadcast %3 : vector<1x32xf32> to vector<8x32xf32>
    %5 = arith.addf %2, %4 : vector<8x32xf32>
    %cst_5 = arith.constant 0.000000e+00 : f32
    %6 = vector.broadcast %cst_5 : f32 to vector<8x32xf32>
    %7 = arith.maximumf %5, %6 : vector<8x32xf32>
    %c0_6 = arith.constant 0 : index
    %c0_7 = arith.constant 0 : index
    %8 = vector.load %arg4[%c0_6, %c0_7] : memref<32x32xf32, #tpu.memory_space<vmem>>, vector<32x32xf32>
    %cst_8 = arith.constant dense<0.000000e+00> : vector<8x32xf32>
    %9 = tpu.matmul %7, %8, %cst_8 {dimension_numbers = #tpu.dot_dimension_numbers<[1], [0], [0], [1], [0, 0, 1, 1], [], []>} : vector<8x32xf32>, vector<32x32xf32>, vector<8x32xf32> -> vector<8x32xf32>
    %c0_9 = arith.constant 0 : index
    %c0_10 = arith.constant 0 : index
    %10 = vector.load %arg5[%c0_9, %c0_10] : memref<1x32xf32, #tpu.memory_space<vmem>>, vector<1x32xf32>
    %11 = vector.broadcast %10 : vector<1x32xf32> to vector<8x32xf32>
    %12 = arith.addf %9, %11 : vector<8x32xf32>
    %13 = arith.addf %12, %0 : vector<8x32xf32>
    %c0_11 = arith.constant 0 : index
    %c0_12 = arith.constant 0 : index
    %14 = vector.load %arg6[%c0_11, %c0_12] : memref<8x32xf32, #tpu.memory_space<vmem>>, vector<8x32xf32>
    tpu.vector_store %arg6[%c0_11, %c0_12], %13 {strides = array<i32>} : memref<8x32xf32, #tpu.memory_space<vmem>>, vector<8x32xf32>,
    return
  }
  func.func @transform_0(%arg0: i32) -> (i32, i32) {
    %c0_i32 = arith.constant 0 : i32
    %c0_i32_0 = arith.constant 0 : i32
    return %arg0, %c0_i32 : i32, i32
  }
  func.func @transform_1(%arg0: i32) -> (i32, i32) {
    %c0_i32 = arith.constant 0 : i32
    %c0_i32_0 = arith.constant 0 : i32
    %c0_i32_1 = arith.constant 0 : i32
    return %c0_i32, %c0_i32_0 : i32, i32
  }
  func.func @transform_2(%arg0: i32) -> (i32, i32) {
    %c0_i32 = arith.constant 0 : i32
    %c0_i32_0 = arith.constant 0 : i32
    %c0_i32_1 = arith.constant 0 : i32
    return %c0_i32, %c0_i32_0 : i32, i32
  }
  func.func @transform_3(%arg0: i32) -> (i32, i32) {
    %c0_i32 = arith.constant 0 : i32
    %c0_i32_0 = arith.constant 0 : i32
    %c0_i32_1 = arith.constant 0 : i32
    return %c0_i32, %c0_i32_0 : i32, i32
  }
  func.func @transform_4(%arg0: i32) -> (i32, i32) {
    %c0_i32 = arith.constant 0 : i32
    %c0_i32_0 = arith.constant 0 : i32
    %c0_i32_1 = arith.constant 0 : i32
    return %c0_i32, %c0_i32_0 : i32, i32
  }
  func.func @transform_5(%arg0: i32) -> (i32, i32) {
    %c0_i32 = arith.constant 0 : i32
    %c0_i32_0 = arith.constant 0 : i32
    return %arg0, %c0_i32 : i32, i32
  }
}

</mosaic_0001>

<bundles_post_ra>
// kernel: pointwise_feedforward.1
= control target key start
LH: loop header
LB: loop body
LE: loop exit
PB: predicated region body
PF: predicated region fallthrough
CT: control target
= control target key end

     0   :  { %10 = vsyncpa [#allocation3], 0  ;;  %s797_s0 = inlined_call_operand.vmem [shape: f32[16,32], index: 0, kind: input, shape index: {}]   ;;  %s798_s1 = inlined_call_operand.vmem [shape: f32[32,32], index: 1, kind: input, shape index: {}]   ;;  %s799_s2 = inlined_call_operand.vmem [shape: f32[1,32], index: 2, kind: input, shape index: {}]   ;;  %s800_s3 = inlined_call_operand.vmem [shape: f32[32,32], index: 3, kind: input, shape index: {}]   ;;  %s801_s4 = inlined_call_operand.vmem [shape: f32[1,32], index: 4, kind: input, shape index: {}]   ;;  %s802_s5 = inlined_call_operand.hbm [shape: f32[16,32], index: 5, kind: output, shape index: {}]  }
   0x1   :  { %12 = vsyncpa [#allocation3 + $0x1], 0  ;;  %s664_s18 = smov 0   ;;  %s666_s19 = smov 0  }
   0x2   :  { %s668_s20 = smov 0   ;;  %s670_s21 = smov 0  }
   0x3 LB: > { %s685_s22 = sadd.s32 4294967295, %s628_s21   ;;  %s466_s23 = sadd.s32 4294967294, %s628_s21   ;;  %s628_s21 = sphi %s670_s21, %s808_s21   ;;  %s624_s20 = sphi %s668_s20, %s807_s20   ;;  %s620_s19 = sphi %s666_s19, %s806_s19   ;;  %s616_s18 = sphi %s664_s18, %s805_s18  }
   0x4   : > { %s689_s24 = sadd.s32 1, %s628_s21   ;;  %s135_s25 = sadd.s32 1, %s624_s20 }
   0x5   : > { %s132_s26 = ssub.s32 %s628_s21, %s689_s24  ;;  %p145_p0 = scmp.ne.s32.totalorder %s624_s20, %s620_s19 }
   0x6   : > { %p133_p1 = scmp.eq.s32.totalorder %s132_s26, 0  ;;  %p146_p2 = scmp.eq.s32.totalorder %s685_s22, 1 }
   0x7   : > { %p151_p3 = scmp.ne.s32.totalorder %s620_s19, %s616_s18  ;;  %p152_p4 = scmp.eq.s32.totalorder %s466_s23, 1 }
   0x8   : > { %s700_s27 = scalar_select %p133_p1, %s624_s20, %s135_s25  }
   0x9   : > { %p702_p5 = por %p146_p2, %p145_p0  ;;  %p706_p6 = por %p152_p4, %p151_p3 }
   0xa   : > { %p469_p7 = scmp.ge.s32.totalorder %s628_s21, 1  ;;  %p189_p8 = scmp.lt.s32.totalorder %s628_s21, 3 }
   0xc   : > { %p190_p9 = pnand %p469_p7, %p189_p8 }
   0xd   : > { %v221_v0 = vld [vmem:[%s798_s1] sm:$0xff] (!%p190_p9)  ;;  %v222_v1 = vld [vmem:[%s798_s1 + $0x8] sm:$0xff] (!%p190_p9)  ;;  %v223_v2 = vld [vmem:[%s798_s1 + $0x10] sm:$0xff] (!%p190_p9)  ;;  %v630_v3 = vmov (!%p190_p9), 0.0|0.0   ;;  %vm631_vm0 = vmmov (!%p190_p9), 0   ;;  %v632_v6 = vmov (!%p190_p9), 0.0  }
   0xe   : > { %193 = sbr.rel (%p190_p9) target bundleno = 472 (0x1d8), region = 40  ;;  %512 = vmatprep.subr.bf16.mxu0 (!%p190_p9), %v630_v3  ;;  %v513_v4 = vpack.c.bf16 (!%p190_p9), %v222_v1, %v221_v0  ;;  %v224_v5 = vld [vmem:[%s798_s1 + $0x18] sm:$0xff] (!%p190_p9)  ;;  %498 = vmatprep.mubr.msk.f32.mxu0 (!%p190_p9), %vm631_vm0, %v632_v6  ;;  %p216_p10 = scmp.lt.s32.totalorder (!%p190_p9), %s685_s22, 1  ;;  %v307_v7 = vld [vmem:[%s800_s3] sm:$0xff] (!%p190_p9)  ;;  %v308_v8 = vld [vmem:[%s800_s3 + $0x8] sm:$0xff] (!%p190_p9)  ;;  %vm232_vm1 = vcmask (!%p190_p9), 261120  }
   0xf   : > { %518 = vmatprep.subr.bf16.mxu1 (!%p190_p9), %v630_v3  ;;  %v519_v9 = vpack.c.bf16 (!%p190_p9), %v308_v8, %v307_v7  ;;  %509 = vmatprep.mubr.msk.f32.mxu1 (!%p190_p9), %vm631_vm0, %v632_v6  ;;  %v516_v10 = vpack.c.bf16 (!%p190_p9), %v224_v5, %v223_v2  ;;  %v309_v12 = vld [vmem:[%s800_s3 + $0x10] sm:$0xff] (!%p190_p9)  ;;  %v310_v13 = vld [vmem:[%s800_s3 + $0x18] sm:$0xff] (!%p190_p9)  ;;  %v472_v15 = vld [vmem:[%s799_s2] ss:$0 sm:$0xff] (!%p190_p9)  ;;  %s213_s12 = sand.u32 (!%p190_p9), 1, %s620_s19   ;;  %s477_s16 = sshll.u32 (!%p190_p9), %s685_s22, 7 }
  0x10   : > { %514 = vmatpush3.bf16.msra.mxu0 (!%p190_p9), %v513_v4  ;;  %v522_v14 = vpack.c.bf16 (!%p190_p9), %v310_v13, %v309_v12  ;;  %s470_s13 = sshll.u32 (!%p190_p9), %s213_s12, 3  ;;  %v474_v20 = vld [vmem:[%s801_s4] ss:$0 sm:$0xff] (!%p190_p9)  ;;  %s394_s6 = scalar_lea.sflag (!%p190_p9), [#allocation3], %s213_s12 }
  0x11   : > { %515 = vmatprep.subr.bf16.mxu0 (!%p190_p9), %v630_v3  ;;  %520 = vmatpush3.bf16.msra.mxu1 (!%p190_p9), %v519_v9 }
  0x12   : > { %521 = vmatprep.subr.bf16.mxu1 (!%p190_p9), %v630_v3 }
  0x14   : > { %517 = vmatpush3.bf16.msra.mxu0 (!%p190_p9), %v516_v10 }
  0x15   : > { %s217_s17 = scalar_select %p216_p10, %s685_s22, 1  ;;  %523 = vmatpush3.bf16.msra.mxu1 %v522_v14 }
  0x16   : > { %s633_s22 = smov [#allocation2]  }
  0x17   : > { %s471_s23 = sshll.u32 %s217_s17, 3  ;;  %s215_s17 = scalar_lea.vmem [#allocation2], %s470_s13 }
  0x18   : > { %s219_s30 = scalar_lea.vmem %s797_s0, %s471_s23  ;;  %s407_s23 = sshll.u32 %s215_s17, 4  ;;  %s756_s23 = int_to_ptr.vmem [resolvable:$true] %s407_s23 }
  0x19   : > { %v220_v11 = vld [vmem:[%s219_s30] sm:$0xff]  ;;  %s754_s30 = scalar_lea.hbm %s802_s5, %s477_s16  ;;  %s566_s7 = scalar_lea.vmem %s756_s23, 128 }
  0x1a   : > { %499 = vmatmul.mubr.msk.f32.vlgmr.msra.gmra.mrb[0].mxu0 %vm232_vm1, %v220_v11  ;;  %p567_p11 = scmp.ne.s32.totalorder %s756_s23, %s566_s7  ;;  %s570_s8 = sshll.u32 %s633_s22, 4  ;;  %s571_s8 = int_to_ptr.vmem [resolvable:$false] %s570_s8 }
  0x1b   : > { %s572_s9 = scalar_lea.vmem %s571_s8, 256  ;;  %p573_p0 = scmp.lt.s32.totalorder %s756_s23, %s571_s8 }
  0x1c   : > { %p568_p12 = pnand %p567_p11, %p702_p5  ;;  %p574_p1 = scmp.lt.s32.totalorder %s572_s9, %s566_s7 }
  0x1e   : > { %p569_p13 = pneg %p568_p12  ;;  %p575_p2 = por %p574_p1, %p573_p0 }
  0x20   : > { %p576_p3 = pnand %p575_p2, %p569_p13 }
  0xed   : > { %v302_v16 = vpop.f32.mrb[0].mxu0 }
  0xee   : > { %v303_v17 = vadd.f32 %v472_v15, %v302_v16  ;;  %v500_v18 = vpop.f32.mrb[1].mxu0 }
  0xf0   : > { %v306_v19 = vmax.f32 %v303_v17, 0.0 }
  0xf2   : > { %510 = vmatmul.mubr.msk.f32.vlgmr.msra.gmra.mrb[0].mxu1 %vm232_vm1, %v306_v19 }
 0x1c5   : > { %v387_v21 = vpop.f32.mrb[0].mxu1 }
 0x1c6   : > { %v388_v22 = vadd.f32 %v474_v20, %v387_v21  ;;  %v511_v23 = vpop.f32.mrb[1].mxu1 }
 0x1c8   : > { %v391_v24 = vadd.f32 %v388_v22, %v220_v11 }
 0x1ca   : > { %392 = vst.msk [vmem:[%s215_s17] sm:$0xff] %vm232_vm1, %v391_v24 }
 0x1cb   : > { %579 = shalt.err (!%p576_p3)
}
 0x1cc   : > { %s580_s10 = scalar_lea.hbm %s754_s30, 128  ;;  %s584_s13 = scalar_lea.hbm %s802_s5, 256 }
 0x1cd   : > { %p581_p4 = scmp.ne.s32.totalorder %s754_s30, %s580_s10  ;;  %p585_p9 = scmp.lt.u32.totalorder %s754_s30, %s802_s5 }
 0x1ce   : > { %p586_p10 = scmp.lt.u32.totalorder %s584_s13, %s580_s10  ;;  %p588_p12 = scmp.lt.u32.totalorder %s580_s10, %s754_s30 }
 0x1cf   : > { %p582_p7 = pnand %p581_p4, %p702_p5 }
 0x1d0   : > { %p587_p11 = por %p586_p10, %p585_p9 }
 0x1d1   : > { %p583_p8 = pneg %p582_p7 }
 0x1d2   : > { %p589_p13 = por %p588_p12, %p587_p11 }
 0x1d4   : > { %p590_p0 = pnand %p589_p13, %p583_p8 }
 0x1d6   : > { %593 = shalt.err (!%p590_p0)
}
 0x1d7   : > { %524 = dma.vmem_to_hbm [thread:$0]  (%p702_p5), %s756_s23, 128, %s754_s30, %s394_s6  }
 0x1d8 PF: > { %p530_p1 = scmp.ge.s32.totalorder %s628_s21, 2  ;;  %s419_s16 = sand.u32 1, %s616_s18  }
 0x1d9   : > { %s420_s17 = scalar_lea.sflag [#allocation3], %s419_s16 }
 0x1da   : > { %p527_p2 = pnand %p530_p1, %p706_p6 }
 0x1dc   : > { %611 = dma.done.wait (!%p527_p2), %s420_s17, 128  }
 0x1dd   : > { %613 = vsyncadd (!%p527_p2), %s420_s17, 4294967168  ;;  %p15_p3 = scmp.ge.s32.totalorder %s689_s24, 4   ;;  %s805_s18 = smov %s620_s19 }
 0x1de   : > { %s806_s19 = smov %s624_s20  ;;  %s807_s20 = smov %s700_s27 }
 0x1df   : > { %s808_s21 = smov %s689_s24  ;;  %17 = sbr.rel (!%p15_p3) target bundleno = 3 (0x3), region = 75 }
 0x1e6   :  { %425 = vsyncpa [#allocation3], 1 }
 0x1e7   :  { %427 = vsyncpa [#allocation3 + $0x1], 1 }

</bundles_post_ra>
